<compile_context>
chip_gen: v7x
topology: tpu7x:2x2x1
jax: 0.10.0
libtpu: 0.0.40
codegen_flags: <defaults>
</compile_context>

<pallas_src>
import functools

import jax
import jax.numpy as jnp
from jax.experimental import pallas as pl
from jax.experimental.pallas import tpu as pltpu


def _dconv_aen_kernel(x_ref,
                      w1_ref, t1_ref,
                      w2_ref, t2_ref,
                      w3_ref, t3_ref,
                      wd_ref,
                      abu_ref, re_ref):
    """One (channels, tile_n) slab of pixels through encoder + decoder."""
    x = x_ref[...]                                                      # (L, TN) f32

    # --- encoder layer 1: Conv2d(L,128,1) + BN(folded) + Dropout(id) + ReLU ---
    h1 = jnp.dot(w1_ref[...], x, preferred_element_type=jnp.float32)    # (128, TN)
    h1 = jnp.maximum(h1 + t1_ref[...], 0.0)

    # --- encoder layer 2: Conv2d(128,64,1) + BN(folded) + ReLU ---
    # Dominant matmul: bf16 inputs, f32 accumulation (w2 is stored bf16).
    h2 = jnp.dot(w2_ref[...], h1.astype(w2_ref.dtype),
                 preferred_element_type=jnp.float32)                    # (64, TN)
    h2 = jnp.maximum(h2 + t2_ref[...], 0.0)

    # --- encoder layer 3: Conv2d(64,P,1) + BN(folded) + Softmax over channels ---
    z = jnp.dot(w3_ref[...], h2, preferred_element_type=jnp.float32)    # (P, TN)
    z = z + t3_ref[...]
    z = z - jnp.max(z, axis=0, keepdims=True)       # channel axis is axis 0 here
    e = jnp.exp(z)
    inv = pl.reciprocal(jnp.sum(e, axis=0, keepdims=True), approx=False)  # EUP slot
    abu = e * inv
    abu_ref[...] = abu.astype(abu_ref.dtype)

    # --- decoder: Conv2d(P,L,1, bias=False) + ReLU ---
    re = jnp.dot(wd_ref[...], abu, preferred_element_type=jnp.float32)  # (L, TN)
    re_ref[...] = jnp.maximum(re, 0.0).astype(re_ref.dtype)


def _round_up(n, m):
    return ((n + m - 1) // m) * m


def dconv_aen_forward(x_nchw, params, *, tile_n=None):
    """DConvAEN forward. x_nchw: (B, L, H, W) f32 -> (abu (B,P,H,W), re (B,L,H,W))."""
    B, L, H, W = x_nchw.shape
    P = params["w3"].shape[0]
    HW = H * W

    # Free reshape: NCHW is contiguous with H*W last, so (B, L, HW) costs nothing.
    x_flat = x_nchw.reshape(B, L, HW)

    # Pixel-tile (lane) size.  For small images a single grid step per batch;
    # cap at 8192 so live f32 intermediates (~0.75 KiB per tile pixel: h1 is
    # 128*TN*4 B, h2 is 64*TN*4 B) plus double-buffered I/O blocks stay ~10 MiB,
    # comfortably inside the explicit VMEM limit below on every generation
    # (v5e/v6e 128 MiB physical, v7x 64 MiB physical).
    if tile_n is None:
        tile_n = min(8192, _round_up(HW, 128))
    tile_n = max(128, (tile_n // 128) * 128)

    # Ragged pixel counts: pad the lane axis, slice the outputs afterwards.
    hw_pad = _round_up(HW, tile_n)
    if hw_pad != HW:
        x_flat = jnp.pad(x_flat, ((0, 0), (0, 0), (0, hw_pad - HW)))

    grid = (B, hw_pad // tile_n)
    full = lambda a: pl.BlockSpec(a.shape, lambda b, i: (0, 0))  # resident weights

    abu_flat, re_flat = pl.pallas_call(
        _dconv_aen_kernel,
        out_shape=(
            jax.ShapeDtypeStruct((B, P, hw_pad), jnp.float32),
            jax.ShapeDtypeStruct((B, L, hw_pad), jnp.float32),
        ),
        grid_spec=pltpu.PrefetchScalarGridSpec(
            num_scalar_prefetch=0,
            grid=grid,
            in_specs=[
                # (batch, channel, pixel-tile): lane-dense, no transpose needed.
                pl.BlockSpec((None, L, tile_n), lambda b, i: (b, 0, i)),
                full(params["w1"]), full(params["t1"]),
                full(params["w2"]), full(params["t2"]),
                full(params["w3"]), full(params["t3"]),
                full(params["wd"]),
            ],
            out_specs=[
                pl.BlockSpec((None, P, tile_n), lambda b, i: (b, 0, i)),
                pl.BlockSpec((None, L, tile_n), lambda b, i: (b, 0, i)),
            ],
        ),
        compiler_params=pltpu.CompilerParams(
            dimension_semantics=("parallel", "parallel"),
            vmem_limit_bytes=48 * 1024 * 1024,
        ),
    )(x_flat,
      params["w1"], params["t1"],
      params["w2"], params["t2"],
      params["w3"], params["t3"],
      params["wd"])

    if hw_pad != HW:
        abu_flat = abu_flat[:, :, :HW]
        re_flat = re_flat[:, :, :HW]
    # Free reshapes back to NCHW (no transpose).
    abu_est = abu_flat.reshape(B, P, H, W)
    re_result = re_flat.reshape(B, L, H, W)
    return abu_est, re_result


def init_params(key, L, P):
    """Deterministic parameter init mirroring the module's layer shapes.

    Conv2d(Cin, Cout, 1) weight is stored PyTorch-style as (Cout, Cin) so the
    kernel can do W @ X with X channel-major.
    BN (eval): gamma=1, beta=0, running_mean=0, running_var=1, eps=1e-5.  The BN
    scale s = gamma/sqrt(var+eps) is folded into the conv weights; the remaining
    per-channel shift t = s*bias + beta - s*mean is stored as a (Cout, 1) column.
    The dominant layer-2 weight is stored bf16 for the MXU fast path.
    """
    eps = 1e-5
    keys = jax.random.split(key, 7)

    def conv_wb(kw, kb, cin, cout):
        bound = 1.0 / (cin ** 0.5)  # PyTorch default kaiming-uniform-ish bound for 1x1
        w = jax.random.uniform(kw, (cout, cin), jnp.float32, -bound, bound)
        b = jax.random.uniform(kb, (cout,), jnp.float32, -bound, bound)
        return w, b

    w1, b1 = conv_wb(keys[0], keys[1], L, 128)
    w2, b2 = conv_wb(keys[2], keys[3], 128, 64)
    w3, b3 = conv_wb(keys[4], keys[5], 64, P)
    # decoder conv, bias=False
    bound_d = 1.0 / (P ** 0.5)
    wd = jax.random.uniform(keys[6], (L, P), jnp.float32, -bound_d, bound_d)

    s = 1.0 / jnp.sqrt(jnp.float32(1.0 + eps))  # gamma=1, running_var=1

    def fold(w, b):
        # fold BN scale into weights (per output channel); keep only the shift.
        return w * s, (s * b)[:, None]

    w1f, t1 = fold(w1, b1)
    w2f, t2 = fold(w2, b2)
    w3f, t3 = fold(w3, b3)

    return dict(w1=w1f, t1=t1,
                w2=w2f.astype(jnp.bfloat16), t2=t2,
                w3=w3f, t3=t3, wd=wd)


def _reference_forward(x_nchw, params):
    """Pure-JAX reference mirroring the kernel math (bf16 layer-2 matmul inputs,
    f32 accumulation everywhere else)."""
    B, L, H, W = x_nchw.shape
    P = params["w3"].shape[0]
    hi = jax.lax.Precision.HIGHEST
    x = x_nchw.reshape(B, L, -1).transpose(1, 0, 2).reshape(L, -1)      # (L, N)
    h1 = jnp.maximum(
        jnp.dot(params["w1"], x, precision=hi) + params["t1"], 0.0)
    h2 = jnp.maximum(
        jnp.dot(params["w2"], h1.astype(jnp.bfloat16),
                preferred_element_type=jnp.float32) + params["t2"], 0.0)
    z = jnp.dot(params["w3"], h2, precision=hi) + params["t3"]
    abu = jax.nn.softmax(z, axis=0)
    re = jnp.maximum(jnp.dot(params["wd"], abu, precision=hi), 0.0)
    abu = abu.reshape(P, B, H * W).transpose(1, 0, 2).reshape(B, P, H, W)
    re = re.reshape(L, B, H * W).transpose(1, 0, 2).reshape(B, L, H, W)
    return abu, re


if __name__ == "__main__":
    key = jax.random.PRNGKey(0)
    k_x, k_p, k_x2 = jax.random.split(key, 3)

    # Small problem: B=2, L(num_bands)=8, P(num_endmembers)=4, H=W=16  (256 px/image)
    B, L, P, H, W = 2, 8, 4, 16, 16
    x = jax.random.normal(k_x, (B, L, H, W), jnp.float32)
    params = init_params(k_p, L, P)

    # Tolerance: layer-2 runs with bf16 matmul inputs (f32 accumulation), so we
    # compare against a reference using the same cast; other layers are f32.
    TOL = 2e-3

    fwd = jax.jit(dconv_aen_forward)
    abu_est, re_result = fwd(x, params)
    jax.block_until_ready((abu_est, re_result))

    abu_ref, re_ref = _reference_forward(x, params)
    assert abu_est.shape == (B, P, H, W) and re_result.shape == (B, L, H, W)
    assert jnp.allclose(abu_est, abu_ref, atol=TOL, rtol=TOL)
    assert jnp.allclose(re_result, re_ref, atol=TOL, rtol=TOL)
    # abundances sum to 1 over the channel axis (softmax dim=1)
    assert jnp.allclose(jnp.sum(abu_est, axis=1), 1.0, atol=1e-4)

    # Multi-step pipelined grid (tile_n=128 -> grid (2, 2)) must match the same math.
    fwd_small_tile = jax.jit(functools.partial(dconv_aen_forward, tile_n=128))
    abu2, re2 = fwd_small_tile(x, params)
    jax.block_until_ready((abu2, re2))
    assert jnp.allclose(abu2, abu_ref, atol=TOL, rtol=TOL)
    assert jnp.allclose(re2, re_ref, atol=TOL, rtol=TOL)

    # Ragged pixel count (H*W = 10*7 = 70, not a multiple of 128) exercises padding.
    xr = jax.random.normal(k_x2, (1, L, 10, 7), jnp.float32)
    abur, rer = fwd(xr, params)
    jax.block_until_ready((abur, rer))
    abur_ref, rer_ref = _reference_forward(xr, params)
    assert abur.shape == (1, P, 10, 7) and rer.shape == (1, L, 10, 7)
    assert jnp.allclose(abur, abur_ref, atol=TOL, rtol=TOL)
    assert jnp.allclose(rer, rer_ref, atol=TOL, rtol=TOL)

    print("KERNEL_OK")
</pallas_src>

<mosaic_0001>
module attributes {stable_mosaic.version = 11 : i64} {
  func.func @_dconv_aen_kernel(%arg0: i32, %arg1: i32, %arg2: memref<1x8x256xf32, #tpu.memory_space<vmem>>, %arg3: memref<128x8xf32, #tpu.memory_space<vmem>>, %arg4: memref<128x1xf32, #tpu.memory_space<vmem>>, %arg5: memref<64x128xbf16, #tpu.memory_space<vmem>>, %arg6: memref<64x1xf32, #tpu.memory_space<vmem>>, %arg7: memref<4x64xf32, #tpu.memory_space<vmem>>, %arg8: memref<4x1xf32, #tpu.memory_space<vmem>>, %arg9: memref<8x4xf32, #tpu.memory_space<vmem>>, %arg10: memref<1x4x256xf32, #tpu.memory_space<vmem>>, %arg11: memref<1x8x256xf32, #tpu.memory_space<vmem>>) attributes {dimension_semantics = [#tpu.dimension_semantics<parallel>, #tpu.dimension_semantics<parallel>], iteration_bounds = array<i64: 2, 1>, scalar_prefetch = 0 : i64, scratch_operands = 0 : i64, tpu.core_type = #tpu.core_type<tc>, window_params = [{transform_indices = @transform_0, window_bounds = array<i64: 1, 8, 256>}, {pipeline_mode = #tpu.pipeline_mode<synchronous>, transform_indices = @transform_1, window_bounds = array<i64: 128, 8>}, {pipeline_mode = #tpu.pipeline_mode<synchronous>, transform_indices = @transform_2, window_bounds = array<i64: 128, 1>}, {pipeline_mode = #tpu.pipeline_mode<synchronous>, transform_indices = @transform_3, window_bounds = array<i64: 64, 128>}, {pipeline_mode = #tpu.pipeline_mode<synchronous>, transform_indices = @transform_4, window_bounds = array<i64: 64, 1>}, {pipeline_mode = #tpu.pipeline_mode<synchronous>, transform_indices = @transform_5, window_bounds = array<i64: 4, 64>}, {pipeline_mode = #tpu.pipeline_mode<synchronous>, transform_indices = @transform_6, window_bounds = array<i64: 4, 1>}, {pipeline_mode = #tpu.pipeline_mode<synchronous>, transform_indices = @transform_7, window_bounds = array<i64: 8, 4>}, {transform_indices = @transform_8, window_bounds = array<i64: 1, 4, 256>}, {transform_indices = @transform_9, window_bounds = array<i64: 1, 8, 256>}]} {
    %c0 = arith.constant 0 : index
    %c0_0 = arith.constant 0 : index
    %c0_1 = arith.constant 0 : index
    %0 = vector.load %arg2[%c0, %c0_0, %c0_1] : memref<1x8x256xf32, #tpu.memory_space<vmem>>, vector<1x8x256xf32>
    %1 = vector.shape_cast %0 : vector<1x8x256xf32> to vector<8x256xf32>
    %c0_2 = arith.constant 0 : index
    %c0_3 = arith.constant 0 : index
    %2 = vector.load %arg3[%c0_2, %c0_3] : memref<128x8xf32, #tpu.memory_space<vmem>>, vector<128x8xf32>
    %cst = arith.constant dense<0.000000e+00> : vector<128x256xf32>
    %3 = tpu.matmul %2, %1, %cst {dimension_numbers = #tpu.dot_dimension_numbers<[1], [0], [0], [1], [0, 0, 1, 1], [], []>} : vector<128x8xf32>, vector<8x256xf32>, vector<128x256xf32> -> vector<128x256xf32>
    %c0_4 = arith.constant 0 : index
    %c0_5 = arith.constant 0 : index
    %4 = vector.load %arg4[%c0_4, %c0_5] : memref<128x1xf32, #tpu.memory_space<vmem>>, vector<128x1xf32>
    %5 = vector.broadcast %4 : vector<128x1xf32> to vector<128x256xf32>
    %6 = arith.addf %3, %5 : vector<128x256xf32>
    %cst_6 = arith.constant 0.000000e+00 : f32
    %7 = vector.broadcast %cst_6 : f32 to vector<128x256xf32>
    %8 = arith.maximumf %6, %7 : vector<128x256xf32>
    %c0_7 = arith.constant 0 : index
    %c0_8 = arith.constant 0 : index
    %9 = vector.load %arg5[%c0_7, %c0_8] : memref<64x128xbf16, #tpu.memory_space<vmem>>, vector<64x128xbf16>
    %10 = arith.truncf %8 : vector<128x256xf32> to vector<128x256xbf16>
    %cst_9 = arith.constant dense<0.000000e+00> : vector<64x256xf32>
    %11 = tpu.matmul %9, %10, %cst_9 {dimension_numbers = #tpu.dot_dimension_numbers<[1], [0], [0], [1], [0, 0, 1, 1], [], []>} : vector<64x128xbf16>, vector<128x256xbf16>, vector<64x256xf32> -> vector<64x256xf32>
    %c0_10 = arith.constant 0 : index
    %c0_11 = arith.constant 0 : index
    %12 = vector.load %arg6[%c0_10, %c0_11] : memref<64x1xf32, #tpu.memory_space<vmem>>, vector<64x1xf32>
    %13 = vector.broadcast %12 : vector<64x1xf32> to vector<64x256xf32>
    %14 = arith.addf %11, %13 : vector<64x256xf32>
    %cst_12 = arith.constant 0.000000e+00 : f32
    %15 = vector.broadcast %cst_12 : f32 to vector<64x256xf32>
    %16 = arith.maximumf %14, %15 : vector<64x256xf32>
    %c0_13 = arith.constant 0 : index
    %c0_14 = arith.constant 0 : index
    %17 = vector.load %arg7[%c0_13, %c0_14] : memref<4x64xf32, #tpu.memory_space<vmem>>, vector<4x64xf32>
    %cst_15 = arith.constant dense<0.000000e+00> : vector<4x256xf32>
    %18 = tpu.matmul %17, %16, %cst_15 {dimension_numbers = #tpu.dot_dimension_numbers<[1], [0], [0], [1], [0, 0, 1, 1], [], []>} : vector<4x64xf32>, vector<64x256xf32>, vector<4x256xf32> -> vector<4x256xf32>
    %c0_16 = arith.constant 0 : index
    %c0_17 = arith.constant 0 : index
    %19 = vector.load %arg8[%c0_16, %c0_17] : memref<4x1xf32, #tpu.memory_space<vmem>>, vector<4x1xf32>
    %20 = vector.broadcast %19 : vector<4x1xf32> to vector<4x256xf32>
    %21 = arith.addf %18, %20 : vector<4x256xf32>
    %cst_18 = arith.constant dense<0xFF800000> : vector<256xf32>
    %22 = vector.multi_reduction <maximumf>, %21, %cst_18 [0] : vector<4x256xf32> to vector<256xf32>
    %23 = vector.shape_cast %22 : vector<256xf32> to vector<1x256xf32>
    %24 = vector.broadcast %23 : vector<1x256xf32> to vector<4x256xf32>
    %25 = arith.subf %21, %24 : vector<4x256xf32>
    %26 = math.exp %25 : vector<4x256xf32>
    %cst_19 = arith.constant dense<0.000000e+00> : vector<256xf32>
    %27 = vector.multi_reduction <add>, %26, %cst_19 [0] : vector<4x256xf32> to vector<256xf32>
    %28 = vector.shape_cast %27 : vector<256xf32> to vector<1x256xf32>
    %29 = tpu.reciprocal %28 : vector<1x256xf32> -> vector<1x256xf32>
    %30 = vector.broadcast %29 : vector<1x256xf32> to vector<4x256xf32>
    %31 = arith.mulf %26, %30 : vector<4x256xf32>
    %c0_20 = arith.constant 0 : index
    %c0_21 = arith.constant 0 : index
    %c0_22 = arith.constant 0 : index
    %32 = vector.load %arg10[%c0_20, %c0_21, %c0_22] : memref<1x4x256xf32, #tpu.memory_space<vmem>>, vector<1x4x256xf32>
    %33 = vector.shape_cast %32 : vector<1x4x256xf32> to vector<4x256xf32>
    %34 = vector.shape_cast %31 : vector<4x256xf32> to vector<1x4x256xf32>
    tpu.vector_store %arg10[%c0_20, %c0_21, %c0_22], %34 {strides = array<i32>} : memref<1x4x256xf32, #tpu.memory_space<vmem>>, vector<1x4x256xf32>,
    %c0_23 = arith.constant 0 : index
    %c0_24 = arith.constant 0 : index
    %35 = vector.load %arg9[%c0_23, %c0_24] : memref<8x4xf32, #tpu.memory_space<vmem>>, vector<8x4xf32>
    %cst_25 = arith.constant dense<0.000000e+00> : vector<8x256xf32>
    %36 = tpu.matmul %35, %31, %cst_25 {dimension_numbers = #tpu.dot_dimension_numbers<[1], [0], [0], [1], [0, 0, 1, 1], [], []>} : vector<8x4xf32>, vector<4x256xf32>, vector<8x256xf32> -> vector<8x256xf32>
    %cst_26 = arith.constant 0.000000e+00 : f32
    %37 = vector.broadcast %cst_26 : f32 to vector<8x256xf32>
    %38 = arith.maximumf %36, %37 : vector<8x256xf32>
    %c0_27 = arith.constant 0 : index
    %c0_28 = arith.constant 0 : index
    %c0_29 = arith.constant 0 : index
    %39 = vector.load %arg11[%c0_27, %c0_28, %c0_29] : memref<1x8x256xf32, #tpu.memory_space<vmem>>, vector<1x8x256xf32>
    %40 = vector.shape_cast %39 : vector<1x8x256xf32> to vector<8x256xf32>
    %41 = vector.shape_cast %38 : vector<8x256xf32> to vector<1x8x256xf32>
    tpu.vector_store %arg11[%c0_27, %c0_28, %c0_29], %41 {strides = array<i32>} : memref<1x8x256xf32, #tpu.memory_space<vmem>>, vector<1x8x256xf32>,
    return
  }
  func.func @transform_0(%arg0: i32, %arg1: i32) -> (i32, i32, i32) {
    %c0_i32 = arith.constant 0 : i32
    %c0_i32_0 = arith.constant 0 : i32
    return %arg0, %c0_i32, %arg1 : i32, i32, i32
  }
  func.func @transform_1(%arg0: i32, %arg1: i32) -> (i32, i32) {
    %c0_i32 = arith.constant 0 : i32
    %c0_i32_0 = arith.constant 0 : i32
    %c0_i32_1 = arith.constant 0 : i32
    return %c0_i32, %c0_i32_0 : i32, i32
  }
  func.func @transform_2(%arg0: i32, %arg1: i32) -> (i32, i32) {
    %c0_i32 = arith.constant 0 : i32
    %c0_i32_0 = arith.constant 0 : i32
    %c0_i32_1 = arith.constant 0 : i32
    return %c0_i32, %c0_i32_0 : i32, i32
  }
  func.func @transform_3(%arg0: i32, %arg1: i32) -> (i32, i32) {
    %c0_i32 = arith.constant 0 : i32
    %c0_i32_0 = arith.constant 0 : i32
    %c0_i32_1 = arith.constant 0 : i32
    return %c0_i32, %c0_i32_0 : i32, i32
  }
  func.func @transform_4(%arg0: i32, %arg1: i32) -> (i32, i32) {
    %c0_i32 = arith.constant 0 : i32
    %c0_i32_0 = arith.constant 0 : i32
    %c0_i32_1 = arith.constant 0 : i32
    return %c0_i32, %c0_i32_0 : i32, i32
  }
  func.func @transform_5(%arg0: i32, %arg1: i32) -> (i32, i32) {
    %c0_i32 = arith.constant 0 : i32
    %c0_i32_0 = arith.constant 0 : i32
    %c0_i32_1 = arith.constant 0 : i32
    return %c0_i32, %c0_i32_0 : i32, i32
  }
  func.func @transform_6(%arg0: i32, %arg1: i32) -> (i32, i32) {
    %c0_i32 = arith.constant 0 : i32
    %c0_i32_0 = arith.constant 0 : i32
    %c0_i32_1 = arith.constant 0 : i32
    return %c0_i32, %c0_i32_0 : i32, i32
  }
  func.func @transform_7(%arg0: i32, %arg1: i32) -> (i32, i32) {
    %c0_i32 = arith.constant 0 : i32
    %c0_i32_0 = arith.constant 0 : i32
    %c0_i32_1 = arith.constant 0 : i32
    return %c0_i32, %c0_i32_0 : i32, i32
  }
  func.func @transform_8(%arg0: i32, %arg1: i32) -> (i32, i32, i32) {
    %c0_i32 = arith.constant 0 : i32
    %c0_i32_0 = arith.constant 0 : i32
    return %arg0, %c0_i32, %arg1 : i32, i32, i32
  }
  func.func @transform_9(%arg0: i32, %arg1: i32) -> (i32, i32, i32) {
    %c0_i32 = arith.constant 0 : i32
    %c0_i32_0 = arith.constant 0 : i32
    return %arg0, %c0_i32, %arg1 : i32, i32, i32
  }
}

</mosaic_0001>

<bundles_post_ra>
// kernel: dconv_aen_forward.1
= control target key start
LH: loop header
LB: loop body
LE: loop exit
PB: predicated region body
PF: predicated region fallthrough
CT: control target
= control target key end

     0   :  { %s1457_s30 = smov 0   ;;  %s1459_s10 = smov 0   ;;  %s1688_s0 = inlined_call_operand.vmem [shape: f32[2,8,256], index: 0, kind: input, shape index: {}]   ;;  %s1689_s1 = inlined_call_operand.vmem [shape: f32[128,8], index: 1, kind: input, shape index: {}]   ;;  %s1690_s2 = inlined_call_operand.vmem [shape: f32[128,1], index: 2, kind: input, shape index: {}]   ;;  %s1691_s3 = inlined_call_operand.vmem [shape: bf16[64,128], index: 3, kind: input, shape index: {}]   ;;  %s1692_s4 = inlined_call_operand.vmem [shape: f32[64,1], index: 4, kind: input, shape index: {}]   ;;  %s1693_s5 = inlined_call_operand.vmem [shape: f32[4,64], index: 5, kind: input, shape index: {}]   ;;  %s1694_s6 = inlined_call_operand.vmem [shape: f32[4,1], index: 6, kind: input, shape index: {}]   ;;  %s1695_s7 = inlined_call_operand.vmem [shape: f32[8,4], index: 7, kind: input, shape index: {}]   ;;  %s1696_s8 = inlined_call_operand.vmem [shape: f32[2,4,256], index: 8, kind: output, shape index: {0}]   ;;  %s1697_s9 = inlined_call_operand.vmem [shape: f32[2,8,256], index: 9, kind: output, shape index: {1}]  }
   0x1   :  { %s1461_s11 = smov 0  }
   0x2 LB: > { %s32_s12 = sadd.s32 1, %s1399_s10  ;;  %p1289_p0 = scmp.ge.s32.totalorder %s1403_s11, 1  ;;  %s1403_s11 = sphi %s1461_s11, %s20_s11   ;;  %s1399_s10 = sphi %s1459_s10, %s1699_s10   ;;  %s1395_s30 = sphi %s1457_s30, %s1698_s30  }
   0x3   : > { %p34_p1 = scmp.ge.s32.totalorder %s32_s12, 2  ;;  %p313_p2 = scmp.lt.s32.totalorder %s1403_s11, 3 }
   0x5   : > { %s1701_s12 = smov (%p34_p1, %s32_s12), 0  ;;  %p314_p3 = pnand %p1289_p0, %p313_p2 }
   0x6   : > { %p367_p4 = scmp.lt.s32.totalorder (!%p314_p3), %s1395_s30, 1  ;;  %v1405_v0 = vmov (!%p314_p3), 0.0   ;;  %v1406_v1 = vmov (!%p314_p3), 0   ;;  %v399_v2 = vld [vmem:[%s1689_s1] sm:$0xff] (!%p314_p3)  ;;  %vm511_vm0 = vcmask (!%p314_p3), 64512   ;;  %v417_v6 = vld [vmem:[%s1690_s2 + $0x10] sm:$0xff] (!%p314_p3) }
   0x7   : > { %317 = sbr.rel (%p314_p3) target bundleno = 1039 (0x40f), region = 52  ;;  %624 = vmatprep.mubr.f32.mxu0 (!%p314_p3), %v1405_v0  ;;  %1367 = vset.pattern.permute.xlu0 (!%p314_p3), %v1406_v1  ;;  %v415_v3 = vld [vmem:[%s1690_s2] sm:$0xff] (!%p314_p3)  ;;  %v416_v7 = vld [vmem:[%s1690_s2 + $0x8] sm:$0xff] (!%p314_p3)  ;;  %v418_v8 = vld [vmem:[%s1690_s2 + $0x18] sm:$0xff] (!%p314_p3)  ;;  %vm945_vm1 = vcmask (!%p314_p3), 523264   ;;  %vm1020_vm2 = vcmask (!%p314_p3), 1043456  }
   0x8   : > { %1368 = vset.pattern.permute.xlu1 (!%p314_p3), %v1406_v1  ;;  %881 = vmatprep.mubr.bf16.mxu1 (!%p314_p3), %v1406_v1  ;;  %v400_v9 = vld [vmem:[%s1689_s1 + $0x8] sm:$0xff] (!%p314_p3)  ;;  %v419_v10 = vld [vmem:[%s1690_s2 + $0x20] sm:$0xff] (!%p314_p3)  ;;  %v401_v12 = vld [vmem:[%s1689_s1 + $0x10] sm:$0xff] (!%p314_p3)  ;;  %vm1065_vm3 = vcmask (!%p314_p3), 31744  }
   0x9   : > { %433 = vperm.xlu0 (!%p314_p3), %1367, %v415_v3   ;;  %443 = vperm.xlu1 (!%p314_p3), %1368, %v417_v6   ;;  %v420_v11 = vld [vmem:[%s1690_s2 + $0x28] sm:$0xff] (!%p314_p3)  ;;  %v421_v13 = vld [vmem:[%s1690_s2 + $0x30] sm:$0xff] (!%p314_p3)  ;;  %v422_v14 = vld [vmem:[%s1690_s2 + $0x38] sm:$0xff] (!%p314_p3) }
   0xa   : > { %v402_v15 = vld [vmem:[%s1689_s1 + $0x18] sm:$0xff] (!%p314_p3)  ;;  %v423_v16 = vld [vmem:[%s1690_s2 + $0x40] sm:$0xff] (!%p314_p3)  ;;  %v424_v17 = vld [vmem:[%s1690_s2 + $0x48] sm:$0xff] (!%p314_p3) }
   0xb   : > { %v403_v18 = vld [vmem:[%s1689_s1 + $0x20] sm:$0xff] (!%p314_p3)  ;;  %v425_v19 = vld [vmem:[%s1690_s2 + $0x50] sm:$0xff] (!%p314_p3)  ;;  %v426_v20 = vld [vmem:[%s1690_s2 + $0x58] sm:$0xff] (!%p314_p3) }
   0xc   : > { %v404_v21 = vld [vmem:[%s1689_s1 + $0x28] sm:$0xff] (!%p314_p3)  ;;  %v427_v22 = vld [vmem:[%s1690_s2 + $0x60] sm:$0xff] (!%p314_p3)  ;;  %v405_v24 = vld [vmem:[%s1689_s1 + $0x30] sm:$0xff] (!%p314_p3) }
   0xd   : > { %438 = vperm.xlu0 (!%p314_p3), %1367, %v416_v7   ;;  %448 = vperm.xlu1 (!%p314_p3), %1368, %v418_v8   ;;  %v428_v23 = vld [vmem:[%s1690_s2 + $0x68] sm:$0xff] (!%p314_p3)  ;;  %v429_v25 = vld [vmem:[%s1690_s2 + $0x70] sm:$0xff] (!%p314_p3)  ;;  %v430_v26 = vld [vmem:[%s1690_s2 + $0x78] sm:$0xff] (!%p314_p3) }
   0xe   : > { %s1703_s30 = smov (!%p367_p4, %s1395_s30), 1  ;;  %v406_v27 = vld [vmem:[%s1689_s1 + $0x38] sm:$0xff]  ;;  %v777_v28 = vld [vmem:[%s1692_s4] sm:$0xff]  ;;  %v778_v29 = vld [vmem:[%s1692_s4 + $0x8] sm:$0xff] }
   0xf   : > { %s1322_s13 = sshll.u32 %s1703_s30, 4  ;;  %v407_v30 = vld [vmem:[%s1689_s1 + $0x40] sm:$0xff]  ;;  %v779_v31 = vld [vmem:[%s1692_s4 + $0x10] sm:$0xff]  ;;  %v780_v32 = vld [vmem:[%s1692_s4 + $0x18] sm:$0xff]  ;;  %s1323_s29 = sshll.u32 %s1703_s30, 3 }
  0x10   : > { %s374_s16 = scalar_lea.vmem %s1688_s0, %s1322_s13  ;;  %v408_v33 = vld [vmem:[%s1689_s1 + $0x48] sm:$0xff]  ;;  %v781_v34 = vld [vmem:[%s1692_s4 + $0x20] sm:$0xff]  ;;  %v409_v36 = vld [vmem:[%s1689_s1 + $0x50] sm:$0xff]  ;;  %s394_s21 = scalar_lea.vmem %s1697_s9, %s1322_s13 }
  0x11   : > { %v398_v4 = vld [vmem:[%s374_s16 + $0x8] sm:$0xff]  ;;  %v397_v5 = vld [vmem:[%s374_s16] sm:$0xff]  ;;  %453 = vperm.xlu0 %1367, %v419_v10   ;;  %458 = vperm.xlu1 %1368, %v420_v11   ;;  %v783_v37 = vld [vmem:[%s1692_s4 + $0x30] sm:$0xff]  ;;  %s384_s16 = scalar_lea.vmem %s1696_s8, %s1323_s29 }
  0x12   : > { %560 = vmatprep.subr.mxu0 %v398_v4  ;;  %v782_v35 = vld [vmem:[%s1692_s4 + $0x28] sm:$0xff]  ;;  %v784_v38 = vld [vmem:[%s1692_s4 + $0x38] sm:$0xff]  ;;  %v939_v40 = vld [vmem:[%s1694_s6] sm:$0xf] }
  0x13   : > { %561 = vmatpush1.msra.mxu0 %v397_v5  ;;  %v410_v39 = vld [vmem:[%s1689_s1 + $0x58] sm:$0xff]  ;;  %v411_v41 = vld [vmem:[%s1689_s1 + $0x60] sm:$0xff]  ;;  %v412_v42 = vld [vmem:[%s1689_s1 + $0x68] sm:$0xff] }
  0x14   : > { %1296 = vmatmul.mubr.msk.f32.vlgmr.msra.gmra.mrb[0].mxu0 %vm511_vm0, %v399_v2  ;;  %v413_v43 = vld [vmem:[%s1689_s1 + $0x70] sm:$0xff]  ;;  %v414_v44 = vld [vmem:[%s1689_s1 + $0x78] sm:$0xff] }
  0x15   : > { %630 = vmatprep.mubr.f32.mxu0 %v1405_v0  ;;  %463 = vperm.xlu0 %1367, %v421_v13  }
  0x16   : > { %468 = vperm.xlu1 %1368, %v422_v14  }
  0x18   : > { %1297 = vmatmul.mubr.msk.f32.gmra.mrb[2].mxu0 %vm511_vm0, %v400_v9 }
  0x19   : > { %636 = vmatprep.mubr.f32.mxu0 %v1405_v0  ;;  %473 = vperm.xlu0 %1367, %v423_v16  }
  0x1a   : > { %478 = vperm.xlu1 %1368, %v424_v17  }
  0x1c   : > { %1298 = vmatmul.mubr.msk.f32.gmra.mrb[4].mxu0 %vm511_vm0, %v401_v12 }
  0x1d   : > { %642 = vmatprep.mubr.f32.mxu0 %v1405_v0  ;;  %483 = vperm.xlu0 %1367, %v425_v19  }
  0x1e   : > { %488 = vperm.xlu1 %1368, %v426_v20  }
  0x20   : > { %1299 = vmatmul.mubr.msk.f32.gmra.mrb[6].mxu0 %vm511_vm0, %v402_v15 }
  0x21   : > { %648 = vmatprep.mubr.f32.mxu0 %v1405_v0  ;;  %493 = vperm.xlu0 %1367, %v427_v22  }
  0x22   : > { %498 = vperm.xlu1 %1368, %v428_v23  }
  0x24   : > { %1300 = vmatmul.mubr.msk.f32.gmra.mrb[8].mxu0 %vm511_vm0, %v403_v18 }
  0x25   : > { %654 = vmatprep.mubr.f32.mxu0 %v1405_v0  ;;  %503 = vperm.xlu0 %1367, %v429_v25  }
  0x26   : > { %508 = vperm.xlu1 %1368, %v430_v26  }
  0x28   : > { %1301 = vmatmul.mubr.msk.f32.gmra.mrb[10].mxu0 %vm511_vm0, %v404_v21 }
  0x29   : > { %660 = vmatprep.mubr.f32.mxu0 %v1405_v0  ;;  %787 = vperm.xlu0 %1367, %v777_v28  }
  0x2a   : > { %792 = vperm.xlu1 %1368, %v778_v29  }
  0x2c   : > { %1302 = vmatmul.mubr.msk.f32.gmra.mrb[12].mxu0 %vm511_vm0, %v405_v24 }
  0x2d   : > { %666 = vmatprep.mubr.f32.mxu0 %v1405_v0  ;;  %797 = vperm.xlu0 %1367, %v779_v31  }
  0x2e   : > { %802 = vperm.xlu1 %1368, %v780_v32  }
  0x30   : > { %1303 = vmatmul.mubr.msk.f32.gmra.mrb[14].mxu0 %vm511_vm0, %v406_v27 }
  0x31   : > { %672 = vmatprep.mubr.f32.mxu0 %v1405_v0  ;;  %807 = vperm.xlu0 %1367, %v781_v34  }
  0x32   : > { %812 = vperm.xlu1 %1368, %v782_v35  }
  0x34   : > { %1304 = vmatmul.mubr.msk.f32.gmra.mrb[16].mxu0 %vm511_vm0, %v407_v30 }
  0x35   : > { %678 = vmatprep.mubr.f32.mxu0 %v1405_v0  ;;  %817 = vperm.xlu0 %1367, %v783_v37  }
  0x36   : > { %822 = vperm.xlu1 %1368, %v784_v38  }
  0x38   : > { %1305 = vmatmul.mubr.msk.f32.gmra.mrb[18].mxu0 %vm511_vm0, %v408_v33 }
  0x39   : > { %684 = vmatprep.mubr.f32.mxu0 %v1405_v0  ;;  %942 = vperm.xlu0 %1367, %v939_v40  }
  0x3c   : > { %1306 = vmatmul.mubr.msk.f32.gmra.mrb[20].mxu0 %vm511_vm0, %v409_v36 }
  0x3d   : > { %690 = vmatprep.mubr.f32.mxu0 %v1405_v0 }
  0x40   : > { %1307 = vmatmul.mubr.msk.f32.gmra.mrb[22].mxu0 %vm511_vm0, %v410_v39 }
  0x41   : > { %696 = vmatprep.mubr.f32.mxu0 %v1405_v0 }
  0x44   : > { %1308 = vmatmul.mubr.msk.f32.gmra.mrb[24].mxu0 %vm511_vm0, %v411_v41 }
  0x45   : > { %702 = vmatprep.mubr.f32.mxu0 %v1405_v0 }
  0x48   : > { %1309 = vmatmul.mubr.msk.f32.gmra.mrb[26].mxu0 %vm511_vm0, %v412_v42 }
  0x49   : > { %708 = vmatprep.mubr.f32.mxu0 %v1405_v0 }
  0x4c   : > { %1310 = vmatmul.mubr.msk.f32.gmra.mrb[28].mxu0 %vm511_vm0, %v413_v43 }
  0x4d   : > { %714 = vmatprep.mubr.f32.mxu0 %v1405_v0 }
  0x50   : > { %1311 = vmatmul.mubr.msk.f32.gmra.mrb[30].mxu0 %vm511_vm0, %v414_v44 }
  0x51   : > { %1137 = vmatprep.mubr.f32.mxu0 %v1405_v0 }
  0x88   : > { %v434_v45 = vpop.permute.xlu0 %433  ;;  %v444_v54 = vpop.permute.xlu1 %443 }
  0x8c   : > { %v439_v49 = vpop.permute.xlu0 %438  ;;  %v449_v3 = vpop.permute.xlu1 %448 }
  0x90   : > { %v454_v16 = vpop.permute.xlu0 %453  ;;  %v459_v19 = vpop.permute.xlu1 %458 }
  0x94   : > { %v464_v32 = vpop.permute.xlu0 %463 }
  0x95   : > { %v469_v35 = vpop.permute.xlu1 %468 }
  0xe7   : > { %v626_v46 = vpop.f32.mrb[0].mxu0 }
  0xe8   : > { %v628_v47 = vpop.f32.mrb[1].mxu0  ;;  %v627_v48 = vadd.f32 %v626_v46, %v434_v45 }
  0xe9   : > { %v629_v50 = vadd.f32 %v628_v47, %v434_v45 }
  0xea   : > { %v721_v56 = vmax.f32 %v627_v48, 0.0  ;;  %v474_v48 = vpop.permute.xlu0 %473 }
  0xeb   : > { %v632_v51 = vpop.f32.mrb[2].mxu0  ;;  %v722_v58 = vmax.f32 %v629_v50, 0.0 }
  0xec   : > { %v633_v52 = vadd.f32 %v632_v51, %v439_v49  ;;  %v634_v53 = vpop.f32.mrb[3].mxu0  ;;  %v479_v51 = vpop.permute.xlu1 %478 }
  0xed   : > { %v635_v55 = vadd.f32 %v634_v53, %v439_v49 }
  0xee   : > { %v723_v57 = vmax.f32 %v633_v52, 0.0 }
  0xef   : > { %v724_v59 = vmax.f32 %v635_v55, 0.0  ;;  %v638_v60 = vpop.f32.mrb[4].mxu0 }
  0xf0   : > { %v640_v61 = vpop.f32.mrb[5].mxu0  ;;  %v761_v62 = vpack.c.bf16 %v723_v57, %v721_v56  ;;  %v639_v2 = vadd.f32 %v638_v60, %v444_v54 }
  0xf1   : > { %v762_v63 = vpack.c.bf16 %v724_v59, %v722_v58  ;;  %v641_v4 = vadd.f32 %v640_v61, %v444_v54 }
  0xf2   : > { %v725_v9 = vmax.f32 %v639_v2, 0.0  ;;  %v484_v2 = vpop.permute.xlu0 %483 }
  0xf3   : > { %v644_v5 = vpop.f32.mrb[6].mxu0  ;;  %849 = vmatprep.subr.bf16.mxu1 %v762_v63  ;;  %v726_v11 = vmax.f32 %v641_v4, 0.0 }
  0xf4   : > { %v645_v6 = vadd.f32 %v644_v5, %v449_v3  ;;  %v646_v7 = vpop.f32.mrb[7].mxu0  ;;  %850 = vmatpush1.bf16.msra.mxu1 %v761_v62  ;;  %v489_v5 = vpop.permute.xlu1 %488 }
  0xf5   : > { %v647_v8 = vadd.f32 %v646_v7, %v449_v3 }
  0xf6   : > { %v727_v10 = vmax.f32 %v645_v6, 0.0 }
  0xf7   : > { %v728_v12 = vmax.f32 %v647_v8, 0.0  ;;  %v650_v13 = vpop.f32.mrb[8].mxu0 }
  0xf8   : > { %v763_v14 = vpack.c.bf16 %v727_v10, %v725_v9  ;;  %v652_v15 = vpop.f32.mrb[9].mxu0  ;;  %v651_v18 = vadd.f32 %v650_v13, %v454_v16 }
  0xf9   : > { %v764_v17 = vpack.c.bf16 %v728_v12, %v726_v11  ;;  %v653_v20 = vadd.f32 %v652_v15, %v454_v16 }
  0xfa   : > { %v729_v25 = vmax.f32 %v651_v18, 0.0  ;;  %v494_v18 = vpop.permute.xlu0 %493 }
  0xfb   : > { %v656_v21 = vpop.f32.mrb[10].mxu0  ;;  %851 = vmatprep.subr.bf16.mxu1 %v764_v17  ;;  %v730_v27 = vmax.f32 %v653_v20, 0.0 }
  0xfc   : > { %v657_v22 = vadd.f32 %v656_v21, %v459_v19  ;;  %v658_v23 = vpop.f32.mrb[11].mxu0  ;;  %852 = vmatpush1.bf16.msra.mxu1 %v763_v14  ;;  %v499_v21 = vpop.permute.xlu1 %498 }
  0xfd   : > { %v659_v24 = vadd.f32 %v658_v23, %v459_v19 }
  0xfe   : > { %v731_v26 = vmax.f32 %v657_v22, 0.0 }
  0xff   : > { %v732_v28 = vmax.f32 %v659_v24, 0.0  ;;  %v662_v29 = vpop.f32.mrb[12].mxu0 }
 0x100   : > { %v765_v30 = vpack.c.bf16 %v731_v26, %v729_v25  ;;  %v664_v31 = vpop.f32.mrb[13].mxu0  ;;  %v663_v34 = vadd.f32 %v662_v29, %v464_v32 }
 0x101   : > { %v766_v33 = vpack.c.bf16 %v732_v28, %v730_v27  ;;  %v665_v36 = vadd.f32 %v664_v31, %v464_v32 }
 0x102   : > { %v733_v41 = vmax.f32 %v663_v34, 0.0  ;;  %v504_v34 = vpop.permute.xlu0 %503 }
 0x103   : > { %v668_v37 = vpop.f32.mrb[14].mxu0  ;;  %853 = vmatprep.subr.bf16.mxu1 %v766_v33  ;;  %v734_v43 = vmax.f32 %v665_v36, 0.0 }
 0x104   : > { %v669_v38 = vadd.f32 %v668_v37, %v469_v35  ;;  %v670_v39 = vpop.f32.mrb[15].mxu0  ;;  %854 = vmatpush1.bf16.msra.mxu1 %v765_v30  ;;  %v509_v37 = vpop.permute.xlu1 %508 }
 0x105   : > { %v671_v40 = vadd.f32 %v670_v39, %v469_v35 }
 0x106   : > { %v735_v42 = vmax.f32 %v669_v38, 0.0 }
 0x107   : > { %v736_v44 = vmax.f32 %v671_v40, 0.0  ;;  %v674_v45 = vpop.f32.mrb[16].mxu0 }
 0x108   : > { %v767_v46 = vpack.c.bf16 %v735_v42, %v733_v41  ;;  %v676_v47 = vpop.f32.mrb[17].mxu0  ;;  %v675_v50 = vadd.f32 %v674_v45, %v474_v48 }
 0x109   : > { %v768_v49 = vpack.c.bf16 %v736_v44, %v734_v43  ;;  %v677_v52 = vadd.f32 %v676_v47, %v474_v48 }
 0x10a   : > { %v737_v57 = vmax.f32 %v675_v50, 0.0  ;;  %v1370_v50 = vld [vmem:[%s1691_s3 + $0x8] sm:$0xff]  }
 0x10b   : > { %v680_v53 = vpop.f32.mrb[18].mxu0  ;;  %855 = vmatprep.subr.bf16.mxu1 %v768_v49  ;;  %v738_v59 = vmax.f32 %v677_v52, 0.0  ;;  %v1369_v49 = vld [vmem:[%s1691_s3] sm:$0xff]   ;;  %v1372_v52 = vld [vmem:[%s1691_s3 + $0x18] sm:$0xff]  }
 0x10c   : > { %v681_v54 = vadd.f32 %v680_v53, %v479_v51  ;;  %v682_v55 = vpop.f32.mrb[19].mxu0  ;;  %856 = vmatpush1.bf16.msra.mxu1 %v767_v46  ;;  %v788_v53 = vpop.permute.xlu0 %787 }
 0x10d   : > { %v683_v56 = vadd.f32 %v682_v55, %v479_v51  ;;  %v1371_v51 = vld [vmem:[%s1691_s3 + $0x10] sm:$0xff]  }
 0x10e   : > { %v739_v58 = vmax.f32 %v681_v54, 0.0 }
 0x10f   : > { %v740_v60 = vmax.f32 %v683_v56, 0.0  ;;  %v686_v61 = vpop.f32.mrb[20].mxu0 }
 0x110   : > { %v769_v62 = vpack.c.bf16 %v739_v58, %v737_v57  ;;  %v688_v63 = vpop.f32.mrb[21].mxu0  ;;  %v687_v4 = vadd.f32 %v686_v61, %v484_v2  ;;  %v793_v57 = vpop.permute.xlu1 %792 }
 0x111   : > { %v770_v3 = vpack.c.bf16 %v740_v60, %v738_v59  ;;  %v689_v6 = vadd.f32 %v688_v63, %v484_v2 }
 0x112   : > { %v741_v11 = vmax.f32 %v687_v4, 0.0 }
 0x113   : > { %v692_v7 = vpop.f32.mrb[22].mxu0  ;;  %857 = vmatprep.subr.bf16.mxu1 %v770_v3  ;;  %v742_v13 = vmax.f32 %v689_v6, 0.0 }
 0x114   : > { %v693_v8 = vadd.f32 %v692_v7, %v489_v5  ;;  %v694_v9 = vpop.f32.mrb[23].mxu0  ;;  %858 = vmatpush1.bf16.msra.mxu1 %v769_v62 }
 0x115   : > { %v695_v10 = vadd.f32 %v694_v9, %v489_v5  ;;  %v798_v5 = vpop.permute.xlu0 %797  ;;  %v803_v9 = vpop.permute.xlu1 %802 }
 0x116   : > { %v743_v12 = vmax.f32 %v693_v8, 0.0 }
 0x117   : > { %v744_v14 = vmax.f32 %v695_v10, 0.0  ;;  %v698_v15 = vpop.f32.mrb[24].mxu0 }
 0x118   : > { %v771_v16 = vpack.c.bf16 %v743_v12, %v741_v11  ;;  %v700_v17 = vpop.f32.mrb[25].mxu0  ;;  %v699_v20 = vadd.f32 %v698_v15, %v494_v18 }
 0x119   : > { %v772_v19 = vpack.c.bf16 %v744_v14, %v742_v13  ;;  %v701_v22 = vadd.f32 %v700_v17, %v494_v18 }
 0x11a   : > { %v745_v27 = vmax.f32 %v699_v20, 0.0  ;;  %v808_v20 = vpop.permute.xlu0 %807 }
 0x11b   : > { %v704_v23 = vpop.f32.mrb[26].mxu0  ;;  %859 = vmatprep.subr.bf16.mxu1 %v772_v19  ;;  %v746_v29 = vmax.f32 %v701_v22, 0.0 }
 0x11c   : > { %v705_v24 = vadd.f32 %v704_v23, %v499_v21  ;;  %v706_v25 = vpop.f32.mrb[27].mxu0  ;;  %860 = vmatpush1.bf16.msra.mxu1 %v771_v16 }
 0x11d   : > { %v707_v26 = vadd.f32 %v706_v25, %v499_v21  ;;  %v813_v25 = vpop.permute.xlu1 %812 }
 0x11e   : > { %v747_v28 = vmax.f32 %v705_v24, 0.0 }
 0x11f   : > { %v748_v30 = vmax.f32 %v707_v26, 0.0  ;;  %v710_v31 = vpop.f32.mrb[28].mxu0 }
 0x120   : > { %v773_v32 = vpack.c.bf16 %v747_v28, %v745_v27  ;;  %v712_v33 = vpop.f32.mrb[29].mxu0  ;;  %v711_v36 = vadd.f32 %v710_v31, %v504_v34 }
 0x121   : > { %v774_v35 = vpack.c.bf16 %v748_v30, %v746_v29  ;;  %v713_v38 = vadd.f32 %v712_v33, %v504_v34 }
 0x122   : > { %v749_v43 = vmax.f32 %v711_v36, 0.0  ;;  %v818_v36 = vpop.permute.xlu0 %817 }
 0x123   : > { %v716_v39 = vpop.f32.mrb[30].mxu0  ;;  %861 = vmatprep.subr.bf16.mxu1 %v774_v35  ;;  %v750_v45 = vmax.f32 %v713_v38, 0.0 }
 0x124   : > { %v717_v40 = vadd.f32 %v716_v39, %v509_v37  ;;  %v718_v41 = vpop.f32.mrb[31].mxu0  ;;  %862 = vmatpush1.bf16.msra.mxu1 %v773_v32 }
 0x125   : > { %v719_v42 = vadd.f32 %v718_v41, %v509_v37  ;;  %v823_v41 = vpop.permute.xlu1 %822 }
 0x126   : > { %v751_v44 = vmax.f32 %v717_v40, 0.0 }
 0x127   : > { %v752_v46 = vmax.f32 %v719_v42, 0.0 }
 0x128   : > { %v775_v47 = vpack.c.bf16 %v751_v44, %v749_v43 }
 0x129   : > { %v776_v48 = vpack.c.bf16 %v752_v46, %v750_v45 }
 0x12b   : > { %863 = vmatprep.subr.bf16.mxu1 %v776_v48 }
 0x12c   : > { %864 = vmatpush1.bf16.msra.mxu1 %v775_v47 }
 0x12f   : > { %882 = vmatmul.mubr.bf16.vlgmr.msra.gmra.mrb[0].mxu1 %v1369_v49 }
 0x130   : > { %891 = vmatprep.mubr.bf16.mxu1 %v1406_v1 }
 0x137   : > { %892 = vmatmul.mubr.bf16.gmra.mrb[4].mxu1 %v1370_v50 }
 0x138   : > { %901 = vmatprep.mubr.bf16.mxu1 %v1406_v1 }
 0x13f   : > { %902 = vmatmul.mubr.bf16.gmra.mrb[8].mxu1 %v1371_v51 }
 0x140   : > { %911 = vmatprep.mubr.bf16.mxu1 %v1406_v1 }
 0x147   : > { %912 = vmatmul.mubr.bf16.gmra.mrb[12].mxu1 %v1372_v52 }
 0x148   : > { %1013 = vmatprep.mubr.f32.mxu1 %v1405_v0 }
 0x202   : > { %v883_v54 = vpop.f32.mrb[0].mxu1 }
 0x203   : > { %v884_v55 = vadd.f32 %v883_v54, %v788_v53  ;;  %v885_v56 = vpop.f32.mrb[1].mxu1  ;;  %v943_v54 = vpop.permute.xlu0 %942 }
 0x204   : > { %v886_v58 = vadd.f32 %v885_v56, %v788_v53  ;;  %v887_v59 = vpop.f32.mrb[2].mxu1  ;;  %v938_v53 = vld [vmem:[%s1693_s5] sm:$0xf] }
 0x205   : > { %v888_v60 = vadd.f32 %v887_v59, %v793_v57  ;;  %v889_v61 = vpop.f32.mrb[3].mxu1  ;;  %v922_v63 = vmax.f32 %v884_v55, 0.0 }
 0x206   : > { %v890_v62 = vadd.f32 %v889_v61, %v793_v57  ;;  %v923_v1 = vmax.f32 %v886_v58, 0.0 }
 0x207   : > { %v924_v2 = vmax.f32 %v888_v60, 0.0 }
 0x208   : > { %v925_v3 = vmax.f32 %v890_v62, 0.0 }
 0x209   : > { %v1327_v4 = vpack.c.bf16 %v924_v2, %v922_v63 }
 0x20a   : > { %v1325_v6 = vpack.c.bf16 %v925_v3, %v923_v1  ;;  %v893_v7 = vpop.f32.mrb[4].mxu1 }
 0x20b   : > { %v894_v8 = vadd.f32 %v893_v7, %v798_v5  ;;  %v895_v0 = vpop.f32.mrb[5].mxu1 }
 0x20c   : > { %v896_v10 = vadd.f32 %v895_v0, %v798_v5  ;;  %v897_v11 = vpop.f32.mrb[6].mxu1  ;;  %1326 = vmatprep.subr.bf16.mxu1 %v1325_v6 }
 0x20d   : > { %v898_v12 = vadd.f32 %v897_v11, %v803_v9  ;;  %v899_v13 = vpop.f32.mrb[7].mxu1  ;;  %1328 = vmatpush1.bf16.msra.mxu1 %v1327_v4  ;;  %v926_v15 = vmax.f32 %v894_v8, 0.0 }
 0x20e   : > { %v900_v14 = vadd.f32 %v899_v13, %v803_v9  ;;  %v927_v17 = vmax.f32 %v896_v10, 0.0 }
 0x20f   : > { %v928_v16 = vmax.f32 %v898_v12, 0.0 }
 0x210   : > { %v929_v18 = vmax.f32 %v900_v14, 0.0 }
 0x211   : > { %v1331_v19 = vpack.c.bf16 %v928_v16, %v926_v15 }
 0x212   : > { %v1329_v21 = vpack.c.bf16 %v929_v18, %v927_v17  ;;  %v903_v22 = vpop.f32.mrb[8].mxu1 }
 0x213   : > { %v904_v23 = vadd.f32 %v903_v22, %v808_v20  ;;  %v905_v24 = vpop.f32.mrb[9].mxu1 }
 0x214   : > { %v906_v26 = vadd.f32 %v905_v24, %v808_v20  ;;  %v907_v27 = vpop.f32.mrb[10].mxu1  ;;  %1330 = vmatprep.subr.bf16.mxu1 %v1329_v21 }
 0x215   : > { %v908_v28 = vadd.f32 %v907_v27, %v813_v25  ;;  %v909_v29 = vpop.f32.mrb[11].mxu1  ;;  %1332 = vmatpush1.bf16.msra.mxu1 %v1331_v19  ;;  %v930_v31 = vmax.f32 %v904_v23, 0.0 }
 0x216   : > { %v910_v30 = vadd.f32 %v909_v29, %v813_v25  ;;  %v931_v33 = vmax.f32 %v906_v26, 0.0 }
 0x217   : > { %v932_v32 = vmax.f32 %v908_v28, 0.0 }
 0x218   : > { %v933_v34 = vmax.f32 %v910_v30, 0.0 }
 0x219   : > { %v1335_v35 = vpack.c.bf16 %v932_v32, %v930_v31 }
 0x21a   : > { %v1333_v37 = vpack.c.bf16 %v933_v34, %v931_v33  ;;  %v913_v38 = vpop.f32.mrb[12].mxu1  ;;  %v1064_v33 = vld [vmem:[%s1695_s7] sm:$0xff] }
 0x21b   : > { %v914_v39 = vadd.f32 %v913_v38, %v818_v36  ;;  %v915_v40 = vpop.f32.mrb[13].mxu1 }
 0x21c   : > { %v916_v42 = vadd.f32 %v915_v40, %v818_v36  ;;  %v917_v43 = vpop.f32.mrb[14].mxu1  ;;  %1334 = vmatprep.subr.bf16.mxu1 %v1333_v37 }
 0x21d   : > { %v918_v44 = vadd.f32 %v917_v43, %v823_v41  ;;  %v919_v45 = vpop.f32.mrb[15].mxu1  ;;  %1336 = vmatpush1.bf16.msra.mxu1 %v1335_v35  ;;  %v934_v47 = vmax.f32 %v914_v39, 0.0 }
 0x21e   : > { %v920_v46 = vadd.f32 %v919_v45, %v823_v41  ;;  %v935_v49 = vmax.f32 %v916_v42, 0.0 }
 0x21f   : > { %v936_v48 = vmax.f32 %v918_v44, 0.0 }
 0x220   : > { %v937_v50 = vmax.f32 %v920_v46, 0.0 }
 0x221   : > { %v1339_v51 = vpack.c.bf16 %v936_v48, %v934_v47 }
 0x222   : > { %v1337_v52 = vpack.c.bf16 %v937_v50, %v935_v49 }
 0x224   : > { %1338 = vmatprep.subr.bf16.mxu1 %v1337_v52 }
 0x225   : > { %1340 = vmatpush1.bf16.msra.mxu1 %v1339_v51 }
 0x228   : > { %1316 = vmatmul.mubr.msk.f32.vlgmr.msra.gmra.mrb[16].mxu1 %vm945_vm1, %v938_v53 }
 0x2fb   : > { %v1015_v55 = vpop.f32.mrb[16].mxu1 }
 0x2fc   : > { %v1016_v56 = vadd.f32 %v1015_v55, %v943_v54  ;;  %v1017_v57 = vpop.f32.mrb[17].mxu1 }
 0x2fd   : > { %v1018_v58 = vadd.f32 %v1017_v57, %v943_v54 }
 0x2fe   : > { %v1021_v59 = vsel %vm1020_vm2, %v1016_v56, -inf }
 0x2ff   : > { %v1022_v60 = vrot.slane %v1021_v59, 4  ;;  %v1028_v61 = vsel %vm1020_vm2, %v1018_v58, -inf }
 0x300   : > { %v1029_v62 = vrot.slane %v1028_v61, 4 }
 0x301   : > { %v1023_v63 = vmax.f32 %v1021_v59, %v1022_v60 }
 0x302   : > { %v1030_v2 = vmax.f32 %v1028_v61, %v1029_v62 }
 0x303   : > { %v1024_v1 = vrot.slane %v1023_v63, 2 }
 0x304   : > { %v1031_v3 = vrot.slane %v1030_v2, 2 }
 0x305   : > { %v1025_v4 = vmax.f32 %v1023_v63, %v1024_v1 }
 0x306   : > { %v1032_v5 = vmax.f32 %v1030_v2, %v1031_v3 }
 0x307   : > { %v1026_v6 = vrot.slane %v1025_v4, 1 }
 0x308   : > { %v1033_v7 = vrot.slane %v1032_v5, 1 }
 0x309   : > { %v1027_v8 = vmax.f32 %v1025_v4, %v1026_v6 }
 0x30a   : > { %v1034_v0 = vmax.f32 %v1032_v5, %v1033_v7 }
 0x30b   : > { %v1035_v9 = vsub.f32 %v1016_v56, %v1027_v8 }
 0x30c   : > { %v1036_v10 = vsub.f32 %v1018_v58, %v1034_v0 }
 0x30d   : > { %v1037_v11 = vmul.f32 1.442695, %v1035_v9 }
 0x30e   : > { %v1039_v12 = vmul.f32 1.442695, %v1036_v10 }
 0x30f   : > { %1373 = vpow2.f32 %v1037_v11 }
 0x310   : > { %1375 = vpow2.f32 %v1039_v12 }
 0x319   : > { %v1374_v13 = vpop.eup %1373 }
 0x31a   : > { %v1376_v14 = vpop.eup %1375  ;;  %v1041_v15 = vsel %vm1020_vm2, %v1374_v13, 0.0 }
 0x31b   : > { %v1042_v16 = vrot.slane %v1041_v15, 4  ;;  %v1048_v17 = vsel %vm1020_vm2, %v1376_v14, 0.0 }
 0x31c   : > { %v1049_v18 = vrot.slane %v1048_v17, 4 }
 0x31d   : > { %v1043_v19 = vadd.f32 %v1042_v16, %v1041_v15 }
 0x31e   : > { %v1050_v20 = vadd.f32 %v1049_v18, %v1048_v17 }
 0x31f   : > { %v1044_v21 = vrot.slane %v1043_v19, 2 }
 0x320   : > { %v1051_v22 = vrot.slane %v1050_v20, 2 }
 0x321   : > { %v1045_v23 = vadd.f32 %v1044_v21, %v1043_v19 }
 0x322   : > { %v1052_v24 = vadd.f32 %v1051_v22, %v1050_v20 }
 0x323   : > { %v1046_v25 = vrot.slane %v1045_v23, 1 }
 0x324   : > { %v1053_v26 = vrot.slane %v1052_v24, 1 }
 0x325   : > { %v1047_v27 = vadd.f32 %v1046_v25, %v1045_v23 }
 0x326   : > { %v1054_v28 = vadd.f32 %v1053_v26, %v1052_v24 }
 0x327   : > { %1377 = vrcp.f32 %v1047_v27 }
 0x328   : > { %1379 = vrcp.f32 %v1054_v28 }
 0x331   : > { %v1378_v29 = vpop.eup %1377 }
 0x332   : > { %v1380_v30 = vpop.eup %1379  ;;  %v1057_v31 = vmul.f32 %v1378_v29, %v1374_v13 }
 0x333   : > { %v1058_v32 = vmul.f32 %v1380_v30, %v1376_v14 }
 0x335   : > { %v1061_v34 = vcombine.low %v1057_v31, %v1058_v32  ;;  %1317 = vmatprep.subr.msk.mxu0 %vm1020_vm2, %v1058_v32 }
 0x336   : > { %1318 = vmatpush1.msk.msra.mxu0 %vm1020_vm2, %v1057_v31 }
 0x337   : > { %1063 = vst [vmem:[%s384_s16] sm:$0xff] %v1061_v34  ;;  %1319 = vmatmul.mubr.msk.f32.vlgmr.msra.gmra.mrb[32].mxu0 %vm1065_vm3, %v1064_v33 }
 0x40a   : > { %v1139_v35 = vpop.f32.mrb[32].mxu0 }
 0x40b   : > { %v1144_v36 = vmax.f32 %v1139_v35, 0.0  ;;  %v1141_v37 = vpop.f32.mrb[33].mxu0 }
 0x40c   : > { %v1145_v38 = vmax.f32 %v1141_v37, 0.0 }
 0x40d   : > { %1146 = vst [vmem:[%s394_s21] sm:$0xff] %v1144_v36 }
 0x40e   : > { %1147 = vst [vmem:[%s394_s21 + $0x8] sm:$0xff] %v1145_v38 }
 0x40f PF: > { %s20_s11 = sadd.s32 1, %s1403_s11   ;;  %s1698_s30 = smov %s1399_s10 }
 0x410   : > { %p17_p5 = scmp.ge.s32.totalorder %s20_s11, 4   ;;  %s1699_s10 = smov %s1701_s12 }
 0x412   :  { %19 = sbr.rel (!%p17_p5) target bundleno = 2 (0x2), region = 94 }

</bundles_post_ra>
